<compile_context>
chip_gen: v7x
topology: tpu7x:2x2x1
jax: 0.10.0
libtpu: 0.0.40
codegen_flags: <defaults>
</compile_context>

<pallas_src>
import jax
import jax.numpy as jnp
from jax.experimental import pallas as pl
from jax.experimental.pallas import tpu as pltpu


def attention_layer_kernel(x_ref, w1_ref, b1_ref, w2_ref, b2_ref, o_ref):
    x = x_ref[...]                      # (tb*S, E) bf16 rows of this batch tile
    w1 = w1_ref[...]                    # (E, H)    bf16
    b1 = b1_ref[...]                    # (1, H)    f32
    b2 = b2_ref[0]                      # scalar, read from SMEM (scalar path)

    tb, S = o_ref.shape
    H = w1.shape[-1]

    # First Linear + ReLU: one 2-D bf16 MXU matmul, f32 accumulation, f32 epilogue.
    h = jnp.dot(x, w1, preferred_element_type=jnp.float32) + b1    # (tb*S, H) f32
    h = jnp.maximum(h, 0.0)

    # Dropout(p=0) == identity -> skipped.

    # Second Linear (out_features = 1).  Static (trace-time) branch on H.
    if H >= 128:
        # Ride the already-warm MXU: (tb*S, H) @ (H, 1) with f32 accumulation.
        # Frees the VALU/XLU slots for the softmax reductions below.
        w2 = w2_ref[...]                                            # (H, 1) f32
        s = jnp.dot(h, w2, preferred_element_type=jnp.float32)      # (tb*S, 1)
        s = s.reshape(tb, S) + b2                                   # relayout to lanes
    else:
        # Tiny H: lane multiply + XLU reduce beats a skinny (N=1) MXU push.
        w2 = w2_ref[...]                                            # (1, H) f32
        s = jnp.sum(h.reshape(tb, S, H) * w2[None, :, :], axis=-1) + b2   # (tb, S)

    # Numerically stable softmax over the sequence axis (dim=-1).
    m = jnp.max(s, axis=-1, keepdims=True)
    e = jnp.exp(s - m)
    denom = jnp.sum(e, axis=-1, keepdims=True)
    inv = pl.reciprocal(denom, approx=True)      # EUP slot, not VALU division
    inv = inv * (2.0 - denom * inv)              # one Newton step -> ~f32 accuracy
    o_ref[...] = (e * inv).astype(o_ref.dtype)


def _vmem_capacity_bytes():
    """Per-TensorCore VMEM capacity; conservative 64 MiB fallback (v7x-sized)."""
    try:
        info = pltpu.get_tpu_info()
        cap = getattr(info, "vmem_capacity_bytes", None)
        if cap:
            return int(cap)
    except Exception:
        pass
    return 64 * 1024 * 1024


def _resident_spec(shape):
    """BlockSpec for an array whose block index never changes (weights/biases).

    pipeline_mode=pl.Buffered(1) avoids burning a second VMEM copy of w1 on
    pointless double-buffering (its DMA happens once).  Falls back to a plain
    spec if this Pallas version does not take the kwarg.
    """
    nd = len(shape)
    index_map = lambda i: (0,) * nd
    try:
        return pl.BlockSpec(shape, index_map, pipeline_mode=pl.Buffered(1))
    except TypeError:
        return pl.BlockSpec(shape, index_map)


def _choose_batch_tile(B, S, E, H, budget_bytes):
    """Pick batches-per-grid-step so the live VMEM footprint fits `budget_bytes`.

    Per flattened row (one sequence position) of a tile:
      x block (bf16, double-buffered) .... 2 * 2*E
      first-matmul output h (f32) ........ 4*H       (single compiler-managed copy)
      scores / exp / out temporaries ..... ~24       (a few small f32 (tb,S) arrays)
    Resident once (single-buffered): w1 (bf16) + b1 + w2.
    Returns (tb, estimated_bytes).
    """
    per_row = 2 * 2 * E + 4 * H + 24
    resident = 2 * E * H + 4 * H + 4 * H

    avail = max(budget_bytes - resident, per_row * S)   # never below one batch group
    tb_cap = max(1, min(B, (avail // per_row) // S))

    def legal(t):
        # (8,128) sublane rule for the f32 (tb,S) output block and 16-row packing
        # for the bf16 (tb*S, E) input block, unless the block covers the full array.
        return B % t == 0 and (t == B or (t % 8 == 0 and (t * S) % 16 == 0))

    tb = None
    for t in range(tb_cap, 0, -1):
        if legal(t):
            tb = t
            break
    if tb is None:
        # Graceful fallback: the smallest legal tile keeps the footprint minimal.
        tb = next((t for t in range(1, B + 1) if legal(t)), B)

    # v7x has 2 TensorCores: give the "parallel" grid axis >= 2 steps when legal.
    # (On 1-TC chips the extra grid step costs ~0.35us -- negligible.)
    if tb == B and B % 2 == 0 and legal(B // 2):
        tb = B // 2

    est = per_row * tb * S + resident
    return tb, est


def attention_layer(x, w1, b1, w2, b2):
    B, S, E = x.shape
    H = w1.shape[1]

    cap = _vmem_capacity_bytes()
    budget = cap // 4                      # ~16 MiB on v7x, ~32 MiB on v5e/v6e
    tb, est_bytes = _choose_batch_tile(B, S, E, H, budget)
    nb = B // tb

    # Layout plumbing in the wrapper (free / one-time): flatten to 2-D rows and
    # cast the matmul operands to bf16 (halves HBM traffic and the VMEM blocks;
    # the MXU accumulates in f32).
    x2d = x.reshape(B * S, E).astype(jnp.bfloat16)
    w1b = w1.astype(jnp.bfloat16)
    b1f = b1.reshape(1, H).astype(jnp.float32)
    use_mxu_l2 = H >= 128
    w2_shape = (H, 1) if use_mxu_l2 else (1, H)
    w2p = w2.reshape(w2_shape).astype(jnp.float32)
    b2f = b2.reshape(1).astype(jnp.float32)

    # Always set the scoped VMEM limit from the real footprint (v5e's default is
    # only 16 MiB) and clamp it to ~85% of physical VMEM (v7x has only 64 MiB).
    vmem_limit = min(int(cap * 0.85), max(32 * 1024 * 1024, int(1.5 * est_bytes)))

    cost = pl.CostEstimate(
        flops=2 * B * S * E * H + 2 * B * S * H + 5 * B * S,
        transcendentals=B * S + B,
        bytes_accessed=2 * B * S * E + 2 * E * H + 8 * H + 4 * B * S,
    )

    # NOTE: for production shapes with S < 128 and large tb*S, a lane-dense output
    # slab (reshaped in the wrapper) would avoid masked vst.msk partial stores; at
    # the shapes exercised here the (tb, S) layout is fine.
    return pl.pallas_call(
        attention_layer_kernel,
        out_shape=jax.ShapeDtypeStruct((B, S), jnp.float32),
        grid=(nb,),
        in_specs=[
            pl.BlockSpec((tb * S, E), lambda i: (i, 0)),           # x rows of this tile
            _resident_spec((E, H)),                                # w1, single-buffered
            _resident_spec((1, H)),                                # b1
            _resident_spec(w2_shape),                              # w2
            pl.BlockSpec(memory_space=pltpu.MemorySpace.SMEM),     # b2 scalar in SMEM
        ],
        out_specs=pl.BlockSpec((tb, S), lambda i: (i, 0)),
        compiler_params=pltpu.CompilerParams(
            dimension_semantics=("parallel",),
            vmem_limit_bytes=vmem_limit,
        ),
        cost_estimate=cost,
    )(x2d, w1b, b1f, w2p, b2f)


def attention_layer_ref(x, w1, b1, w2, b2, *, match_kernel_dtypes=True):
    """Pure-JAX reference matching the PyTorch module (optionally bf16-matched)."""
    B, S, E = x.shape
    H = w1.shape[1]
    if match_kernel_dtypes:
        h = jnp.dot(
            x.reshape(B * S, E).astype(jnp.bfloat16),
            w1.astype(jnp.bfloat16),
            preferred_element_type=jnp.float32,
        ).reshape(B, S, H) + b1.reshape(1, 1, H)
    else:
        h = jnp.einsum("bse,eh->bsh", x, w1) + b1.reshape(1, 1, H)
    h = jnp.maximum(h, 0.0)
    s = jnp.einsum("bsh,h->bs", h, w2.reshape(H)) + b2.reshape(())
    return jax.nn.softmax(s, axis=-1)


if __name__ == "__main__":
    # Small shapes consistent with the module's forward.
    B, S = 2, 8              # batch, sequence length
    E, H = 32, 32            # embedding_dim, hidden_dim

    key = jax.random.PRNGKey(0)
    kx, k1, k2, k3, k4 = jax.random.split(key, 5)

    x = jax.random.normal(kx, (B, S, E), dtype=jnp.float32)

    # Deterministic PyTorch-style uniform(-1/sqrt(fan_in), +) parameter init.
    bound1 = 1.0 / (E ** 0.5)
    bound2 = 1.0 / (H ** 0.5)
    w1 = jax.random.uniform(k1, (E, H), jnp.float32, -bound1, bound1)
    b1 = jax.random.uniform(k2, (H,), jnp.float32, -bound1, bound1)
    w2 = jax.random.uniform(k3, (1, H), jnp.float32, -bound2, bound2)
    b2 = jax.random.uniform(k4, (1,), jnp.float32, -bound2, bound2)

    out = attention_layer(x, w1, b1, w2, b2)
    out = jax.block_until_ready(out)
    assert out.shape == (B, S), out.shape

    # (a) tight check against a reference that uses the same bf16 matmul inputs.
    ref_bf16 = attention_layer_ref(x, w1, b1, w2, b2, match_kernel_dtypes=True)
    assert jnp.allclose(out, ref_bf16, atol=1e-4, rtol=1e-4), (
        "mismatch vs bf16-matched reference: max err "
        f"{float(jnp.max(jnp.abs(out - ref_bf16)))}"
    )
    # (b) semantic check against the pure-f32 module (bf16-level tolerance).
    ref_f32 = attention_layer_ref(x, w1, b1, w2, b2, match_kernel_dtypes=False)
    assert jnp.allclose(out, ref_f32, atol=3e-2, rtol=3e-2), (
        "mismatch vs f32 reference: max err "
        f"{float(jnp.max(jnp.abs(out - ref_f32)))}"
    )
    # Softmax rows sum to 1.
    assert jnp.allclose(jnp.sum(out, axis=-1), 1.0, atol=1e-4)

    print("KERNEL_OK")
</pallas_src>

<mosaic_0001>
module attributes {stable_mosaic.version = 11 : i64} {
  func.func @attention_layer_kernel(%arg0: i32, %arg1: memref<16x32xbf16, #tpu.memory_space<vmem>>, %arg2: memref<32x32xbf16, #tpu.memory_space<vmem>>, %arg3: memref<1x32xf32, #tpu.memory_space<vmem>>, %arg4: memref<1x32xf32, #tpu.memory_space<vmem>>, %arg5: memref<1xf32, #tpu.memory_space<smem>>, %arg6: memref<2x8xf32, #tpu.memory_space<vmem>>) attributes {dimension_semantics = [#tpu.dimension_semantics<parallel>], iteration_bounds = array<i64: 1>, scalar_prefetch = 0 : i64, scratch_operands = 0 : i64, tpu.core_type = #tpu.core_type<tc>, window_params = [{transform_indices = @transform_0, window_bounds = array<i64: 16, 32>}, {pipeline_mode = #tpu.pipeline_mode<synchronous>, transform_indices = @transform_1, window_bounds = array<i64: 32, 32>}, {pipeline_mode = #tpu.pipeline_mode<synchronous>, transform_indices = @transform_2, window_bounds = array<i64: 1, 32>}, {pipeline_mode = #tpu.pipeline_mode<synchronous>, transform_indices = @transform_3, window_bounds = array<i64: 1, 32>}, {transform_indices = @transform_4, window_bounds = array<i64: 1>}, {transform_indices = @transform_5, window_bounds = array<i64: 2, 8>}]} {
    %c0 = arith.constant 0 : index
    %c0_0 = arith.constant 0 : index
    %0 = vector.load %arg1[%c0, %c0_0] : memref<16x32xbf16, #tpu.memory_space<vmem>>, vector<16x32xbf16>
    %c0_1 = arith.constant 0 : index
    %c0_2 = arith.constant 0 : index
    %1 = vector.load %arg2[%c0_1, %c0_2] : memref<32x32xbf16, #tpu.memory_space<vmem>>, vector<32x32xbf16>
    %c0_3 = arith.constant 0 : index
    %c0_4 = arith.constant 0 : index
    %2 = vector.load %arg3[%c0_3, %c0_4] : memref<1x32xf32, #tpu.memory_space<vmem>>, vector<1x32xf32>
    %c0_5 = arith.constant 0 : index
    %3 = memref.load %arg5[%c0_5] : memref<1xf32, #tpu.memory_space<smem>>
    %cst = arith.constant dense<0.000000e+00> : vector<16x32xf32>
    %4 = tpu.matmul %0, %1, %cst {dimension_numbers = #tpu.dot_dimension_numbers<[1], [0], [0], [1], [0, 0, 1, 1], [], []>} : vector<16x32xbf16>, vector<32x32xbf16>, vector<16x32xf32> -> vector<16x32xf32>
    %5 = vector.broadcast %2 : vector<1x32xf32> to vector<16x32xf32>
    %6 = arith.addf %4, %5 : vector<16x32xf32>
    %cst_6 = arith.constant 0.000000e+00 : f32
    %7 = vector.broadcast %cst_6 : f32 to vector<16x32xf32>
    %8 = arith.maximumf %6, %7 : vector<16x32xf32>
    %c0_7 = arith.constant 0 : index
    %c0_8 = arith.constant 0 : index
    %9 = vector.load %arg4[%c0_7, %c0_8] : memref<1x32xf32, #tpu.memory_space<vmem>>, vector<1x32xf32>
    %10 = vector.shape_cast %8 : vector<16x32xf32> to vector<2x8x32xf32>
    %11 = vector.shape_cast %9 : vector<1x32xf32> to vector<1x1x32xf32>
    %12 = vector.broadcast %11 : vector<1x1x32xf32> to vector<2x8x32xf32>
    %13 = arith.mulf %10, %12 : vector<2x8x32xf32>
    %cst_9 = arith.constant dense<0.000000e+00> : vector<2x8xf32>
    %14 = vector.multi_reduction <add>, %13, %cst_9 [2] : vector<2x8x32xf32> to vector<2x8xf32>
    %15 = vector.broadcast %3 : f32 to vector<2x8xf32>
    %16 = arith.addf %14, %15 : vector<2x8xf32>
    %cst_10 = arith.constant dense<0xFF800000> : vector<2xf32>
    %17 = vector.multi_reduction <maximumf>, %16, %cst_10 [1] : vector<2x8xf32> to vector<2xf32>
    %18 = vector.shape_cast %17 : vector<2xf32> to vector<2x1xf32>
    %19 = vector.broadcast %18 : vector<2x1xf32> to vector<2x8xf32>
    %20 = arith.subf %16, %19 : vector<2x8xf32>
    %21 = math.exp %20 : vector<2x8xf32>
    %cst_11 = arith.constant dense<0.000000e+00> : vector<2xf32>
    %22 = vector.multi_reduction <add>, %21, %cst_11 [1] : vector<2x8xf32> to vector<2xf32>
    %23 = vector.shape_cast %22 : vector<2xf32> to vector<2x1xf32>
    %24 = tpu.reciprocal %23 {approx = true} : vector<2x1xf32> -> vector<2x1xf32>
    %25 = arith.mulf %23, %24 : vector<2x1xf32>
    %cst_12 = arith.constant 2.000000e+00 : f32
    %26 = vector.broadcast %cst_12 : f32 to vector<2x1xf32>
    %27 = arith.subf %26, %25 : vector<2x1xf32>
    %28 = arith.mulf %24, %27 : vector<2x1xf32>
    %29 = vector.broadcast %28 : vector<2x1xf32> to vector<2x8xf32>
    %30 = arith.mulf %21, %29 : vector<2x8xf32>
    %c0_13 = arith.constant 0 : index
    %c0_14 = arith.constant 0 : index
    %31 = vector.load %arg6[%c0_13, %c0_14] : memref<2x8xf32, #tpu.memory_space<vmem>>, vector<2x8xf32>
    tpu.vector_store %arg6[%c0_13, %c0_14], %30 {strides = array<i32>} : memref<2x8xf32, #tpu.memory_space<vmem>>, vector<2x8xf32>,
    return
  }
  func.func @transform_0(%arg0: i32) -> (i32, i32) {
    %c0_i32 = arith.constant 0 : i32
    %c0_i32_0 = arith.constant 0 : i32
    return %arg0, %c0_i32 : i32, i32
  }
  func.func @transform_1(%arg0: i32) -> (i32, i32) {
    %c0_i32 = arith.constant 0 : i32
    %c0_i32_0 = arith.constant 0 : i32
    %c0_i32_1 = arith.constant 0 : i32
    return %c0_i32, %c0_i32_0 : i32, i32
  }
  func.func @transform_2(%arg0: i32) -> (i32, i32) {
    %c0_i32 = arith.constant 0 : i32
    %c0_i32_0 = arith.constant 0 : i32
    %c0_i32_1 = arith.constant 0 : i32
    return %c0_i32, %c0_i32_0 : i32, i32
  }
  func.func @transform_3(%arg0: i32) -> (i32, i32) {
    %c0_i32 = arith.constant 0 : i32
    %c0_i32_0 = arith.constant 0 : i32
    %c0_i32_1 = arith.constant 0 : i32
    return %c0_i32, %c0_i32_0 : i32, i32
  }
  func.func @transform_4(%arg0: i32) -> i32 {
    %c0_i32 = arith.constant 0 : i32
    %c0_i32_0 = arith.constant 0 : i32
    return %c0_i32 : i32
  }
  func.func @transform_5(%arg0: i32) -> (i32, i32) {
    %c0_i32 = arith.constant 0 : i32
    %c0_i32_0 = arith.constant 0 : i32
    return %arg0, %c0_i32 : i32, i32
  }
}

</mosaic_0001>

<bundles_post_ra>
// kernel: tpu_custom_call.1
= control target key start
LH: loop header
LB: loop body
LE: loop exit
PB: predicated region body
PF: predicated region fallthrough
CT: control target
= control target key end

     0   :  { %11 = vsyncpa [#allocation4], 0  ;;  %s456_s0 = inlined_call_operand.hbm [shape: bf16[16,32], index: 0, kind: input, shape index: {}]   ;;  %s457_s1 = inlined_call_operand.hbm [shape: bf16[32,32], index: 1, kind: input, shape index: {}]   ;;  %s458_s2 = inlined_call_operand.vmem [shape: f32[1,32], index: 2, kind: input, shape index: {}]   ;;  %s459_s3 = inlined_call_operand.vmem [shape: f32[1,32], index: 3, kind: input, shape index: {}]   ;;  %s460_s4 = inlined_call_operand.<no memory space> [shape: f32[1], index: 4, kind: input, shape index: {}]   ;;  %s461_s5 = inlined_call_operand.hbm [shape: f32[2,8], index: 5, kind: output, shape index: {}]  }
   0x1   :  { %12 = vsyncpa [#allocation7], 0 }
   0x2   :  { %13 = vsyncpa [#allocation5], 0  ;;  %s364_s18 = smov [#allocation3]   ;;  %s292_s22 = scalar_lea.hbm %s456_s0, 128 }
   0x3   :  { %s19_s19 = sshll.u32 %s364_s18, 4  ;;  %p293_p0 = scmp.ne.s32.totalorder %s456_s0, %s292_s22  ;;  %s20_s19 = int_to_ptr.vmem [resolvable:$true] %s19_s19 }
   0x4   :  { %p296_p1 = scmp.lt.u32.totalorder %s292_s22, %s456_s0 }
   0x6   :  { %p298_p2 = pnand %p296_p1, %p293_p0 }
   0x8   :  { %301 = shalt.err (!%p298_p2)
}
   0x9   :  { %s302_s27 = scalar_lea.vmem %s20_s19, 128  ;;  %p307_p4 = scmp.lt.s32.totalorder %s20_s19, %s20_s19 }
   0xa   :  { %p303_p3 = scmp.ne.s32.totalorder %s20_s19, %s302_s27  ;;  %p308_p5 = scmp.lt.s32.totalorder %s302_s27, %s302_s27 }
   0xc   :  { %p309_p6 = por %p308_p5, %p307_p4 }
   0xe   :  { %p310_p7 = pnand %p309_p6, %p303_p3 }
  0x10   :  { %313 = shalt.err (!%p310_p7)
}
  0x11   :  { %s365_s28 = smov 64   ;;  %s366_s29 = smov 4  }
  0x12   :  { %25 = dma.hbm_to_vmem [thread:$0]  %s456_s0, 128, %s20_s19, [#allocation4], %s365_s28, %s365_s28, %s366_s29  }
  0x13   :  { %s367_s7 = smov [#allocation6]   ;;  %s314_s11 = scalar_lea.hbm %s457_s1, 256 }
  0x14   :  { %s31_s8 = sshll.u32 %s367_s7, 4  ;;  %p315_p8 = scmp.ne.s32.totalorder %s457_s1, %s314_s11  ;;  %s32_s8 = int_to_ptr.vmem [resolvable:$true] %s31_s8 }
  0x15   :  { %p318_p9 = scmp.lt.u32.totalorder %s314_s11, %s457_s1 }
  0x17   :  { %p320_p10 = pnand %p318_p9, %p315_p8 }
  0x19   :  { %323 = shalt.err (!%p320_p10)
}
  0x1a   :  { %s324_s16 = scalar_lea.vmem %s32_s8, 256  ;;  %p329_p12 = scmp.lt.s32.totalorder %s32_s8, %s32_s8 }
  0x1b   :  { %p325_p11 = scmp.ne.s32.totalorder %s32_s8, %s324_s16  ;;  %p330_p13 = scmp.lt.s32.totalorder %s324_s16, %s324_s16 }
  0x1d   :  { %p331_p0 = por %p330_p13, %p329_p12 }
  0x1f   :  { %p332_p1 = pnand %p331_p0, %p325_p11 }
  0x21   :  { %335 = shalt.err (!%p332_p1)
}
  0x22   :  { %37 = dma.hbm_to_vmem [thread:$0]  %s457_s1, 256, %s32_s8, [#allocation7], %s365_s28, %s365_s28, %s366_s29  }
  0x23   :  { %358 = dma.done.wait [#allocation4], 128  }
  0x24   :  { %359 = vsyncadd [#allocation4], 4294967168 }
  0x25   :  { %360 = dma.done.wait [#allocation7], 256  }
  0x26   :  { %361 = vsyncadd [#allocation7], 4294967040  ;;  %v368_v0 = vmov 0.0   ;;  %vm369_vm0 = vmmov 0   ;;  %v283_v1 = vld [vmem:[#allocation6] sm:$0xff]   ;;  %v284_v2 = vld [vmem:[#allocation6 + $0x8] sm:$0xff]   ;;  %v149_v18 = vlaneseq  ;;  %v144_v21 = vstv %s460_s4 }
  0x27   :  { %265 = vmatprep.subr.bf16.mxu0 %v368_v0  ;;  %269 = vmatprep.mubr.msk.bf16.mxu0 %vm369_vm0, %v368_v0  ;;  %v285_v3 = vld [vmem:[#allocation3] sm:$0xff]   ;;  %vm82_vm1 = vcmask 261120   ;;  %vm159_vm2 = vcmask 1041409   ;;  %vm162_vm3 = vcmask 58368   ;;  %v370_v31 = vmov 0  }
  0x28   :  { %266 = vmatpush3.bf16.msra.mxu0 %v283_v1  ;;  %v256_v4 = vld [vmem:[%s458_s2] ss:$0 sm:$0xff]  ;;  %v150_v19 = vand.u32 127, %v149_v18  ;;  %v152_v20 = vshrl.u32 %v149_v18, 7  ;;  %282 = vset.pattern.permute.xlu0 %v370_v31 }
  0x29   :  { %267 = vmatprep.subr.bf16.mxu0 %v368_v0  ;;  %v261_v9 = vld [vmem:[%s459_s3] ss:$0 sm:$0xff]  ;;  %281 = vset.pattern.permute.xlu1 %v370_v31  ;;  %s371_s3 = smov [#allocation8]  }
  0x2a   :  { %v153_v23 = vsub.s32 %v150_v19, %v152_v20  ;;  %v169_v32 = vsub.s32 0, %v152_v20  ;;  %v173_v33 = vsub.s32 1, %v152_v20  ;;  %s246_s4 = sshll.u32 %s371_s3, 4  ;;  %s247_s4 = int_to_ptr.vmem [resolvable:$true] %s246_s4 }
  0x2b   :  { %s336_s22 = scalar_lea.vmem %s247_s4, 32  ;;  %p341_p3 = scmp.lt.s32.totalorder %s247_s4, %s247_s4 }
  0x2c   :  { %268 = vmatpush3.bf16.msra.mxu0 %v284_v2  ;;  %p337_p2 = scmp.ne.s32.totalorder %s247_s4, %s336_s22  ;;  %p342_p4 = scmp.lt.s32.totalorder %s336_s22, %s336_s22 }
  0x2e   :  { %p343_p5 = por %p342_p4, %p341_p3 }
  0x2f   :  { %270 = vmatmul.mubr.msk.bf16.vlgmr.msra.gmra.mrb[0].mxu0 %vm82_vm1, %v285_v3 }
  0x30   :  { %p344_p6 = pnand %p343_p5, %p337_p2 }
 0x102   :  { %v120_v5 = vpop.f32.mrb[0].mxu0 }
 0x103   :  { %v121_v6 = vadd.f32 %v256_v4, %v120_v5  ;;  %v271_v7 = vpop.f32.mrb[1].mxu0 }
 0x104   :  { %v123_v8 = vpop.f32.mrb[2].mxu0 }
 0x105   :  { %v127_v10 = vmax.f32 %v121_v6, 0.0  ;;  %v124_v11 = vadd.f32 %v256_v4, %v123_v8  ;;  %v272_v12 = vpop.f32.mrb[3].mxu0 }
 0x107   :  { %v128_v13 = vmax.f32 %v124_v11, 0.0  ;;  %v136_v14 = vmul.f32 %v261_v9, %v127_v10 }
 0x109   :  { %v138_v15 = vsel %vm82_vm1, %v136_v14, 0.0  ;;  %v137_v16 = vmul.f32 %v261_v9, %v128_v13 }
 0x10a   :  { %139 = vadd.xlane.f32.xlu0 %v138_v15 }
 0x10b   :  { %v141_v17 = vsel %vm82_vm1, %v137_v16, 0.0 }
 0x10e   :  { %142 = vadd.xlane.f32.xlu0 %v141_v17 }
 0x197   :  { %v140_v22 = vpop.xlane.xlu0 %139 }
 0x198   :  { %v145_v24 = vadd.f32 %v144_v21, %v140_v22 }
 0x19a   :  { %v154_v27 = vrot.slane %v145_v24, %v153_v23 }
 0x19b   :  { %v143_v25 = vpop.xlane.xlu0 %142 }
 0x19c   :  { %v146_v26 = vadd.f32 %v144_v21, %v143_v25 }
 0x19e   :  { %v158_v28 = vrot.slane %v146_v26, %v153_v23 }
 0x1a0   :  { %v160_v29 = vsel %vm159_vm2, %v158_v28, %v154_v27 }
 0x1a1   :  { %v163_v30 = vsel %vm162_vm3, %v160_v29, -inf }
 0x1a2   :  { %164 = vmax.xlane.f32.xlu1 %v163_v30 }
 0x22f   :  { %v165_v34 = vpop.xlane.xlu1 %164 }
 0x230   :  { %v170_v35 = vrot.slane %v165_v34, %v169_v32  ;;  %v174_v36 = vrot.slane %v165_v34, %v173_v33 }
 0x232   :  { %v177_v37 = vsub.f32 %v145_v24, %v170_v35  ;;  %v178_v38 = vsub.f32 %v146_v26, %v174_v36 }
 0x234   :  { %v179_v39 = vmul.f32 1.442695, %v177_v37  ;;  %v181_v40 = vmul.f32 1.442695, %v178_v38 }
 0x236   :  { %286 = vpow2.f32 %v179_v39 }
 0x237   :  { %288 = vpow2.f32 %v181_v40 }
 0x240   :  { %v287_v41 = vpop.eup %286 }
 0x241   :  { %v289_v42 = vpop.eup %288  ;;  %186 = vperm.xlu1 %281, %v287_v41  }
 0x242   :  { %189 = vperm.xlu0 %282, %v289_v42  }
 0x2c0   :  { %v187_v43 = vpop.permute.xlu1 %186 }
 0x2c1   :  { %v190_v44 = vpop.permute.xlu0 %189  ;;  %v194_v45 = vrot.slane %v187_v43, %v153_v23 }
 0x2c2   :  { %v198_v46 = vrot.slane %v190_v44, %v153_v23 }
 0x2c4   :  { %v199_v47 = vsel %vm159_vm2, %v198_v46, %v194_v45 }
 0x2c5   :  { %v201_v48 = vsel %vm162_vm3, %v199_v47, 0.0 }
 0x2c6   :  { %202 = vadd.xlane.f32.xlu1 %v201_v48 }
 0x353   :  { %v203_v49 = vpop.xlane.xlu1 %202 }
 0x354   :  { %290 = vrcp.f32 %v203_v49 }
 0x35e   :  { %v291_v50 = vpop.eup %290 }
 0x35f   :  { %v205_v51 = vmul.f32 %v291_v50, %v203_v49 }
 0x361   :  { %v206_v52 = vsub.f32 2.0, %v205_v51 }
 0x363   :  { %v207_v53 = vmul.f32 %v291_v50, %v206_v52 }
 0x365   :  { %v212_v54 = vrot.slane %v207_v53, %v169_v32  ;;  %v216_v55 = vrot.slane %v207_v53, %v173_v33 }
 0x367   :  { %v219_v56 = vmul.f32 %v287_v41, %v212_v54  ;;  %v220_v57 = vmul.f32 %v289_v42, %v216_v55 }
 0x369   :  { %224 = vperm.xlu0 %282, %v219_v56  }
 0x36d   :  { %227 = vperm.xlu0 %282, %v220_v57  }
 0x3e8   :  { %v225_v58 = vpop.permute.xlu0 %224 }
 0x3e9   :  { %v232_v60 = vrot.slane %v225_v58, %v153_v23 }
 0x3ec   :  { %v228_v59 = vpop.permute.xlu0 %227 }
 0x3ed   :  { %v236_v61 = vrot.slane %v228_v59, %v153_v23 }
 0x3ef   :  { %v237_v62 = vsel %vm159_vm2, %v236_v61, %v232_v60 }
 0x3f0   :  { %239 = vst.msk [vmem:[#allocation8] sm:$0x3] %vm162_vm3, %v237_v62 }
 0x3f1   :  { %347 = shalt.err (!%p344_p6)
}
 0x3f2   :  { %s348_s25 = scalar_lea.hbm %s461_s5, 32 }
 0x3f3   :  { %p349_p7 = scmp.ne.s32.totalorder %s461_s5, %s348_s25  ;;  %p352_p8 = scmp.lt.u32.totalorder %s348_s25, %s461_s5 }
 0x3f5   :  { %p354_p9 = pnand %p352_p8, %p349_p7 }
 0x3f7   :  { %357 = shalt.err (!%p354_p9)
}
 0x3f8   :  { %249 = dma.vmem_to_hbm [thread:$0]  %s247_s4, 32, %s461_s5, [#allocation5]  }
 0x3f9   :  { %362 = dma.done.wait [#allocation5], 32  }
 0x3fa   :  { %363 = vsyncadd [#allocation5], 4294967264 }
 0x3fb   :  { %253 = vsyncpa [#allocation4], 1 }
 0x3fc   :  { %254 = vsyncpa [#allocation7], 1 }
 0x3fd   :  { %255 = vsyncpa [#allocation5], 1 }

</bundles_post_ra>
